<compile_context>
chip_gen: v7x
topology: tpu7x:2x2x1
jax: 0.10.0
libtpu: 0.0.40
codegen_flags: <defaults>
</compile_context>

<pallas_src>
import functools
import math

import jax
import jax.numpy as jnp
from jax import lax
from jax.experimental import pallas as pl
from jax.experimental.pallas import tpu as pltpu


# -----------------------------------------------------------------------------
# VMEM-aware tile sizing.
#   v7x: 64 MiB physical / 32 MiB default-scoped VMEM; v5e/v6e: 128 MiB.
#   Budget ~24 MiB of double-buffered tile traffic per grid step and raise the
#   scoped limit to 48 MiB (valid on every generation, headroom for scratch).
# -----------------------------------------------------------------------------
_TILE_BUDGET_BYTES = 24 * 1024 * 1024
_VMEM_LIMIT_BYTES = 48 * 1024 * 1024
_MAX_IMAGES_PER_BLOCK = 8            # bounds the static per-image unroll


def _round_down(x, m):
    return max(m, (x // m) * m)


# =============================================================================
# Fused Downsample kernel: conv2d(k=2, s=2) + channel_first ChannelLayerNorm
# =============================================================================
def _downsample_kernel(p_ref, w_ref, b_ref, g_ref, bt_ref, o_ref, *,
                       eps, out_channels, images_per_block):
    # p_ref : (tn, K, thw)  im2col'd 2x2/stride-2 patches (K = Cin*4)
    # w_ref : (Cout, K)     conv weight flattened to (co, ci*4 + di*2 + dj)
    # b_ref/g_ref/bt_ref : (Cout, 1)  conv bias / LN gamma / LN beta
    # o_ref : (tn, Cout, thw)  NCHW-flattened output slab (lane-dense stores)
    w = w_ref[...].astype(jnp.float32)                          # (Cout, K)
    b = b_ref[...]                                              # (Cout, 1)
    g = g_ref[...]
    bt = bt_ref[...]

    # Static unroll over the images packed into this block (tn <= 8).  Each
    # iteration is a self-contained matmul + LN whose results are stored
    # immediately, so live ranges stay short.
    for i in range(images_per_block):
        patches = p_ref[i].astype(jnp.float32)                  # (K, thw)
        conv = jnp.dot(w, patches,
                       preferred_element_type=jnp.float32,
                       precision=lax.Precision.HIGHEST)         # (Cout, thw)
        conv = conv + b

        # channel_first layer norm (torch semantics): per spatial position,
        # mean and UNBIASED std over channels, y = gamma*(x-mean)/(std+eps)+beta.
        # NOTE: out_channels == 1 yields NaN (divide by C-1), matching torch.
        mean = jnp.mean(conv, axis=0, keepdims=True)             # (1, thw)
        diff = conv - mean
        var_unb = (jnp.sum(diff * diff, axis=0, keepdims=True)
                   / (out_channels - 1))
        inv = pl.reciprocal(jnp.sqrt(var_unb) + eps, approx=False)
        o_ref[i] = (g * (diff * inv) + bt).astype(o_ref.dtype)


def downsample_forward(x, weight, bias, gamma, beta, eps=1e-6):
    """x: (N, Cin, H, W), weight: (Cout, Cin, 2, 2) -> (N, Cout, H//2, W//2)."""
    N, Cin, H, W = x.shape
    Cout = weight.shape[0]
    assert H % 2 == 0 and W % 2 == 0, "kernel_size=2 / stride=2 needs even H, W"
    Ho, Wo, K = H // 2, W // 2, Cin * 4
    HWo = Ho * Wo

    # Wrapper-side im2col (pure layout plumbing, one XLA transpose):
    # (N, Cin, H, W) -> (N, K, Ho*Wo), K ordered (ci, di, dj) to match the
    # flattened (Cout, Cin, 2, 2) weight.
    patches = (x.reshape(N, Cin, Ho, 2, Wo, 2)
                 .transpose(0, 1, 3, 5, 2, 4)
                 .reshape(N, K, HWo))
    w2 = weight.reshape(Cout, K)
    b2 = bias.reshape(Cout, 1).astype(jnp.float32)
    g2 = gamma.reshape(Cout, 1).astype(jnp.float32)
    bt2 = beta.reshape(Cout, 1).astype(jnp.float32)

    # Tile the spatial axis against the VMEM budget (weight counted
    # conservatively as double-buffered even though its block index is const).
    w_bytes = 8 * K * Cout
    col_bytes = 8 * (K + Cout)           # 2x patch col + 2x out col, f32 bound
    avail = max(_TILE_BUDGET_BYTES - w_bytes, 2 * 1024 * 1024)
    cap = max(128, min(2048, _round_down(avail // col_bytes, 128)))
    thw = HWo if HWo <= cap else cap     # ragged spatial edge handled by clipping
    tn = 1
    if thw == HWo:
        # Whole image per spatial tile: batch several images into one grid step
        # to amortize per-step pipeline overhead on small feature maps.
        tn = int(min(N, max(1, avail // (col_bytes * HWo)),
                     _MAX_IMAGES_PER_BLOCK))
    grid = (pl.cdiv(N, tn), pl.cdiv(HWo, thw))

    out = pl.pallas_call(
        functools.partial(_downsample_kernel, eps=eps, out_channels=Cout,
                          images_per_block=tn),
        out_shape=jax.ShapeDtypeStruct((N, Cout, HWo), x.dtype),
        grid_spec=pltpu.PrefetchScalarGridSpec(
            num_scalar_prefetch=0,
            grid=grid,
            in_specs=[
                pl.BlockSpec((tn, K, thw), lambda n, s: (n, 0, s)),
                pl.BlockSpec((Cout, K), lambda n, s: (0, 0)),
                pl.BlockSpec((Cout, 1), lambda n, s: (0, 0)),
                pl.BlockSpec((Cout, 1), lambda n, s: (0, 0)),
                pl.BlockSpec((Cout, 1), lambda n, s: (0, 0)),
            ],
            out_specs=pl.BlockSpec((tn, Cout, thw), lambda n, s: (n, 0, s)),
        ),
        compiler_params=pltpu.CompilerParams(
            dimension_semantics=("parallel", "parallel"),
            vmem_limit_bytes=_VMEM_LIMIT_BYTES,
        ),
        cost_estimate=pl.CostEstimate(
            flops=int(2 * N * HWo * K * Cout + 10 * N * HWo * Cout),
            transcendentals=int(N * HWo),
            bytes_accessed=int((N * K * HWo + K * Cout + N * Cout * HWo)
                               * jnp.dtype(x.dtype).itemsize),
        ),
    )(patches, w2, b2, g2, bt2)
    return out.reshape(N, Cout, Ho, Wo)


# =============================================================================
# Standalone ChannelLayerNorm kernels (both torch modes)
# =============================================================================
def _cl_kernel(x_ref, g_ref, b_ref, o_ref, *, eps):
    # channel_last == torch F.layer_norm over last dim: biased var, rsqrt(var+eps)
    x = x_ref[...].astype(jnp.float32)                       # (tm, C)
    mean = jnp.mean(x, axis=-1, keepdims=True)
    diff = x - mean
    var = jnp.mean(diff * diff, axis=-1, keepdims=True)
    inv = lax.rsqrt(var + eps)
    o_ref[...] = (diff * inv * g_ref[...] + b_ref[...]).astype(o_ref.dtype)


def channel_layer_norm_last(x, gamma, beta, eps=1e-6):
    C = x.shape[-1]
    lead = x.shape[:-1]
    M = math.prod(lead) if lead else 1
    x2 = x.reshape(M, C)
    g2 = gamma.reshape(1, C).astype(jnp.float32)
    b2 = beta.reshape(1, C).astype(jnp.float32)

    bytes_per_row = 16 * C               # 2 in + 2 out buffers, f32 upper bound
    cap = min(2048, _round_down(_TILE_BUDGET_BYTES // bytes_per_row, 8))
    tm = M if M <= cap else cap          # fixed tile + cdiv: pipelining stays on
    grid = (pl.cdiv(M, tm),)
    # TODO(synk): for C < 128 a channels-on-sublanes layout would give lane-dense
    # stores; Downsample never uses this mode so the simple layout is kept.

    out = pl.pallas_call(
        functools.partial(_cl_kernel, eps=eps),
        out_shape=jax.ShapeDtypeStruct((M, C), x.dtype),
        grid_spec=pltpu.PrefetchScalarGridSpec(
            num_scalar_prefetch=0,
            grid=grid,
            in_specs=[
                pl.BlockSpec((tm, C), lambda i: (i, 0)),
                pl.BlockSpec((1, C), lambda i: (0, 0)),
                pl.BlockSpec((1, C), lambda i: (0, 0)),
            ],
            out_specs=pl.BlockSpec((tm, C), lambda i: (i, 0)),
        ),
        compiler_params=pltpu.CompilerParams(
            dimension_semantics=("parallel",),
            vmem_limit_bytes=_VMEM_LIMIT_BYTES,
        ),
        cost_estimate=pl.CostEstimate(
            flops=int(10 * M * C),
            transcendentals=int(M),
            bytes_accessed=int(2 * M * C * jnp.dtype(x.dtype).itemsize),
        ),
    )(x2, g2, b2)
    return out.reshape(*lead, C)


def _cf_kernel(x_ref, g_ref, b_ref, o_ref, *, eps, num_channels):
    # channel_first: per (n, h, w), UNBIASED std over channels (torch .std()),
    # y = gamma*(x-mean)/(std+eps) + beta.  num_channels==1 -> NaN like torch.
    x = x_ref[...].astype(jnp.float32)                       # (tn, C, thw)
    mean = jnp.mean(x, axis=1, keepdims=True)
    diff = x - mean
    var_unb = jnp.sum(diff * diff, axis=1, keepdims=True) / (num_channels - 1)
    inv = pl.reciprocal(jnp.sqrt(var_unb) + eps, approx=False)
    o_ref[...] = (g_ref[...] * (diff * inv) + b_ref[...]).astype(o_ref.dtype)


def channel_layer_norm_first(x, gamma, beta, eps=1e-6):
    N, C, H, W = x.shape
    HW = H * W
    x3 = x.reshape(N, C, HW)
    g3 = gamma.reshape(1, C, 1).astype(jnp.float32)
    b3 = beta.reshape(1, C, 1).astype(jnp.float32)

    bytes_per_col = 16 * C               # 2 in + 2 out buffers, f32 upper bound
    cap = min(2048, _round_down(_TILE_BUDGET_BYTES // bytes_per_col, 128))
    thw = HW if HW <= cap else cap       # ragged HW edge handled by clipping
    tn = 1
    if thw == HW:                        # whole image per block: batch images
        tn = int(min(N, max(1, _TILE_BUDGET_BYTES // (bytes_per_col * HW))))
    grid = (pl.cdiv(N, tn), pl.cdiv(HW, thw))

    out = pl.pallas_call(
        functools.partial(_cf_kernel, eps=eps, num_channels=C),
        out_shape=jax.ShapeDtypeStruct((N, C, HW), x.dtype),
        grid_spec=pltpu.PrefetchScalarGridSpec(
            num_scalar_prefetch=0,
            grid=grid,
            in_specs=[
                pl.BlockSpec((tn, C, thw), lambda n, s: (n, 0, s)),
                pl.BlockSpec((1, C, 1), lambda n, s: (0, 0, 0)),
                pl.BlockSpec((1, C, 1), lambda n, s: (0, 0, 0)),
            ],
            out_specs=pl.BlockSpec((tn, C, thw), lambda n, s: (n, 0, s)),
        ),
        compiler_params=pltpu.CompilerParams(
            dimension_semantics=("parallel", "parallel"),
            vmem_limit_bytes=_VMEM_LIMIT_BYTES,
        ),
        cost_estimate=pl.CostEstimate(
            flops=int(10 * N * C * HW),
            transcendentals=int(N * HW),
            bytes_accessed=int(2 * N * C * HW * jnp.dtype(x.dtype).itemsize),
        ),
    )(x3, g3, b3)
    return out.reshape(N, C, H, W)


# =============================================================================
# Module-equivalent wrappers
# =============================================================================
class ChannelLayerNorm:
    def __init__(self, num_features, eps=1e-6, mode="channel_last"):
        self.num_features = num_features
        self.eps = eps
        self.mode = mode
        self.gamma = jnp.ones((num_features,), dtype=jnp.float32)
        self.beta = jnp.zeros((num_features,), dtype=jnp.float32)

    def __call__(self, x):
        if self.mode == "channel_last":
            return channel_layer_norm_last(x, self.gamma, self.beta, self.eps)
        elif self.mode == "channel_first":
            return channel_layer_norm_first(x, self.gamma, self.beta, self.eps)
        raise ValueError(self.mode)


class Downsample:
    """Conv2d(in, out, k=2, s=2) + ChannelLayerNorm(out, 'channel_first'),
    executed as a single fused Pallas kernel."""

    def __init__(self, in_channel, out_channel, eps=1e-6, key=None):
        self.in_channel = in_channel
        self.out_channel = out_channel
        self.eps = eps
        if key is None:
            key = jax.random.PRNGKey(0)
        kw, kb = jax.random.split(key)
        bound = 1.0 / math.sqrt(in_channel * 4)
        self.weight = jax.random.uniform(kw, (out_channel, in_channel, 2, 2),
                                         jnp.float32, -bound, bound)
        self.bias = jax.random.uniform(kb, (out_channel,), jnp.float32,
                                       -bound, bound)
        self.gamma = jnp.ones((out_channel,), dtype=jnp.float32)
        self.beta = jnp.zeros((out_channel,), dtype=jnp.float32)

    def __call__(self, x):
        return downsample_forward(x, self.weight, self.bias,
                                  self.gamma, self.beta, self.eps)


# =============================================================================
# Pure-JAX references (torch semantics) for verification
# =============================================================================
def _ref_last(x, gamma, beta, eps):
    x = x.astype(jnp.float32)
    mean = jnp.mean(x, axis=-1, keepdims=True)
    var = jnp.mean((x - mean) ** 2, axis=-1, keepdims=True)
    return (x - mean) * lax.rsqrt(var + eps) * gamma + beta


def _ref_first(x, gamma, beta, eps):
    x = x.astype(jnp.float32)
    C = x.shape[1]
    mean = jnp.mean(x, axis=1, keepdims=True)
    std = jnp.sqrt(jnp.sum((x - mean) ** 2, axis=1, keepdims=True) / (C - 1))
    return gamma[:, None, None] * (x - mean) / (std + eps) + beta[:, None, None]


def _ref_downsample(x, weight, bias, gamma, beta, eps):
    y = lax.conv_general_dilated(
        x.astype(jnp.float32), weight.astype(jnp.float32),
        window_strides=(2, 2), padding="VALID",
        dimension_numbers=("NCHW", "OIHW", "NCHW"),
        precision=lax.Precision.HIGHEST)
    y = y + bias[None, :, None, None]
    return _ref_first(y, gamma, beta, eps)


if __name__ == "__main__":
    key = jax.random.PRNGKey(0)
    k1, k2, k3, k4, k5, k6 = jax.random.split(key, 6)
    eps = 1e-6

    def bf16_exact(a):
        # Quantize to the bf16 grid so MXU matmul rounding cannot affect checks.
        return a.astype(jnp.bfloat16).astype(jnp.float32)

    def check_downsample(kx, kp, N, Cin, Cout, H, W):
        x = bf16_exact(jax.random.normal(kx, (N, Cin, H, W), dtype=jnp.float32))
        ds = Downsample(Cin, Cout, eps=eps, key=kp)
        ds.weight = bf16_exact(ds.weight)
        ds.bias = bf16_exact(ds.bias)
        ds.gamma = jnp.linspace(0.5, 1.5, Cout, dtype=jnp.float32)
        ds.beta = jnp.linspace(-0.2, 0.2, Cout, dtype=jnp.float32)
        y = jax.block_until_ready(ds(x))
        ref = _ref_downsample(x, ds.weight, ds.bias, ds.gamma, ds.beta, eps)
        assert y.shape == (N, Cout, H // 2, W // 2)
        assert jnp.allclose(y, ref, rtol=1e-4, atol=1e-4), \
            float(jnp.max(jnp.abs(y - ref)))

    # ---- fused Downsample: base shape ----
    check_downsample(k1, k3, N=2, Cin=4, Cout=8, H=16, W=16)
    # ---- odd channel counts (K / Cout equal to full dims, not 8-multiples) ----
    check_downsample(k4, k5, N=3, Cin=3, Cout=6, H=8, W=8)
    # ---- ragged image-batching edge (N > images_per_block cap) ----
    check_downsample(k6, k3, N=10, Cin=4, Cout=8, H=16, W=16)

    # ---- standalone ChannelLayerNorm, channel_first ----
    N, Cin, H, W = 2, 4, 16, 16
    x_cf = jax.random.normal(k2, (N, Cin, H, W), dtype=jnp.float32)
    ln_cf = ChannelLayerNorm(Cin, eps=eps, mode="channel_first")
    ln_cf.gamma = jnp.linspace(0.5, 1.5, Cin, dtype=jnp.float32)
    ln_cf.beta = jnp.linspace(-0.2, 0.2, Cin, dtype=jnp.float32)
    y_cf = jax.block_until_ready(ln_cf(x_cf))
    assert jnp.allclose(y_cf, _ref_first(x_cf, ln_cf.gamma, ln_cf.beta, eps),
                        rtol=1e-5, atol=1e-5)

    # ---- standalone ChannelLayerNorm, channel_last ----
    x_cl = jax.random.normal(k2, (N, H, W, Cin), dtype=jnp.float32)
    ln_cl = ChannelLayerNorm(Cin, eps=eps, mode="channel_last")
    ln_cl.gamma = jnp.linspace(0.5, 1.5, Cin, dtype=jnp.float32)
    ln_cl.beta = jnp.linspace(-0.2, 0.2, Cin, dtype=jnp.float32)
    y_cl = jax.block_until_ready(ln_cl(x_cl))
    assert jnp.allclose(y_cl, _ref_last(x_cl, ln_cl.gamma, ln_cl.beta, eps),
                        rtol=1e-5, atol=1e-5)

    print("KERNEL_OK")
</pallas_src>

<mosaic_0001>
module attributes {stable_mosaic.version = 11 : i64} {
  func.func @_downsample_kernel(%arg0: i32, %arg1: i32, %arg2: memref<2x16x64xf32, #tpu.memory_space<vmem>>, %arg3: memref<8x16xf32, #tpu.memory_space<vmem>>, %arg4: memref<8x1xf32, #tpu.memory_space<vmem>>, %arg5: memref<8x1xf32, #tpu.memory_space<vmem>>, %arg6: memref<8x1xf32, #tpu.memory_space<vmem>>, %arg7: memref<2x8x64xf32, #tpu.memory_space<vmem>>) attributes {dimension_semantics = [#tpu.dimension_semantics<parallel>, #tpu.dimension_semantics<parallel>], iteration_bounds = array<i64: 1, 1>, scalar_prefetch = 0 : i64, scratch_operands = 0 : i64, tpu.core_type = #tpu.core_type<tc>, window_params = [{transform_indices = @transform_0, window_bounds = array<i64: 2, 16, 64>}, {pipeline_mode = #tpu.pipeline_mode<synchronous>, transform_indices = @transform_1, window_bounds = array<i64: 8, 16>}, {pipeline_mode = #tpu.pipeline_mode<synchronous>, transform_indices = @transform_2, window_bounds = array<i64: 8, 1>}, {pipeline_mode = #tpu.pipeline_mode<synchronous>, transform_indices = @transform_3, window_bounds = array<i64: 8, 1>}, {pipeline_mode = #tpu.pipeline_mode<synchronous>, transform_indices = @transform_4, window_bounds = array<i64: 8, 1>}, {transform_indices = @transform_5, window_bounds = array<i64: 2, 8, 64>}]} {
    %c0 = arith.constant 0 : index
    %c0_0 = arith.constant 0 : index
    %0 = vector.load %arg3[%c0, %c0_0] : memref<8x16xf32, #tpu.memory_space<vmem>>, vector<8x16xf32>
    %c0_1 = arith.constant 0 : index
    %c0_2 = arith.constant 0 : index
    %1 = vector.load %arg4[%c0_1, %c0_2] : memref<8x1xf32, #tpu.memory_space<vmem>>, vector<8x1xf32>
    %c0_3 = arith.constant 0 : index
    %c0_4 = arith.constant 0 : index
    %2 = vector.load %arg5[%c0_3, %c0_4] : memref<8x1xf32, #tpu.memory_space<vmem>>, vector<8x1xf32>
    %c0_5 = arith.constant 0 : index
    %c0_6 = arith.constant 0 : index
    %3 = vector.load %arg6[%c0_5, %c0_6] : memref<8x1xf32, #tpu.memory_space<vmem>>, vector<8x1xf32>
    %c0_7 = arith.constant 0 : index
    %c0_8 = arith.constant 0 : index
    %c0_9 = arith.constant 0 : index
    %4 = vector.load %arg2[%c0_7, %c0_8, %c0_9] : memref<2x16x64xf32, #tpu.memory_space<vmem>>, vector<1x16x64xf32>
    %5 = vector.shape_cast %4 : vector<1x16x64xf32> to vector<16x64xf32>
    %cst = arith.constant dense<0.000000e+00> : vector<8x64xf32>
    %6 = tpu.matmul %0, %5, %cst {dimension_numbers = #tpu.dot_dimension_numbers<[1], [0], [0], [1], [0, 0, 1, 1], [], []>, precision = #tpu.contract_precision<fp32>} : vector<8x16xf32>, vector<16x64xf32>, vector<8x64xf32> -> vector<8x64xf32>
    %7 = vector.broadcast %1 : vector<8x1xf32> to vector<8x64xf32>
    %8 = arith.addf %6, %7 : vector<8x64xf32>
    %cst_10 = arith.constant dense<0.000000e+00> : vector<64xf32>
    %9 = vector.multi_reduction <add>, %8, %cst_10 [0] : vector<8x64xf32> to vector<64xf32>
    %10 = vector.shape_cast %9 : vector<64xf32> to vector<1x64xf32>
    %cst_11 = arith.constant 8.000000e+00 : f32
    %11 = vector.broadcast %cst_11 : f32 to vector<1x64xf32>
    %12 = arith.divf %10, %11 : vector<1x64xf32>
    %13 = vector.broadcast %12 : vector<1x64xf32> to vector<8x64xf32>
    %14 = arith.subf %8, %13 : vector<8x64xf32>
    %15 = arith.mulf %14, %14 : vector<8x64xf32>
    %cst_12 = arith.constant dense<0.000000e+00> : vector<64xf32>
    %16 = vector.multi_reduction <add>, %15, %cst_12 [0] : vector<8x64xf32> to vector<64xf32>
    %17 = vector.shape_cast %16 : vector<64xf32> to vector<1x64xf32>
    %cst_13 = arith.constant 7.000000e+00 : f32
    %18 = vector.broadcast %cst_13 : f32 to vector<1x64xf32>
    %19 = arith.divf %17, %18 : vector<1x64xf32>
    %20 = math.sqrt %19 : vector<1x64xf32>
    %cst_14 = arith.constant 9.99999997E-7 : f32
    %21 = vector.broadcast %cst_14 : f32 to vector<1x64xf32>
    %22 = arith.addf %20, %21 : vector<1x64xf32>
    %23 = tpu.reciprocal %22 : vector<1x64xf32> -> vector<1x64xf32>
    %24 = vector.broadcast %23 : vector<1x64xf32> to vector<8x64xf32>
    %25 = arith.mulf %14, %24 : vector<8x64xf32>
    %26 = vector.broadcast %2 : vector<8x1xf32> to vector<8x64xf32>
    %27 = arith.mulf %26, %25 : vector<8x64xf32>
    %28 = vector.broadcast %3 : vector<8x1xf32> to vector<8x64xf32>
    %29 = arith.addf %27, %28 : vector<8x64xf32>
    %c0_15 = arith.constant 0 : index
    %c0_16 = arith.constant 0 : index
    %c0_17 = arith.constant 0 : index
    %30 = vector.load %arg7[%c0_15, %c0_16, %c0_17] : memref<2x8x64xf32, #tpu.memory_space<vmem>>, vector<1x8x64xf32>
    %31 = vector.shape_cast %30 : vector<1x8x64xf32> to vector<8x64xf32>
    %32 = vector.shape_cast %29 : vector<8x64xf32> to vector<1x8x64xf32>
    tpu.vector_store %arg7[%c0_15, %c0_16, %c0_17], %32 {strides = array<i32>} : memref<2x8x64xf32, #tpu.memory_space<vmem>>, vector<1x8x64xf32>,
    %c1 = arith.constant 1 : index
    %c0_18 = arith.constant 0 : index
    %c0_19 = arith.constant 0 : index
    %33 = vector.load %arg2[%c1, %c0_18, %c0_19] : memref<2x16x64xf32, #tpu.memory_space<vmem>>, vector<1x16x64xf32>
    %34 = vector.shape_cast %33 : vector<1x16x64xf32> to vector<16x64xf32>
    %cst_20 = arith.constant dense<0.000000e+00> : vector<8x64xf32>
    %35 = tpu.matmul %0, %34, %cst_20 {dimension_numbers = #tpu.dot_dimension_numbers<[1], [0], [0], [1], [0, 0, 1, 1], [], []>, precision = #tpu.contract_precision<fp32>} : vector<8x16xf32>, vector<16x64xf32>, vector<8x64xf32> -> vector<8x64xf32>
    %36 = vector.broadcast %1 : vector<8x1xf32> to vector<8x64xf32>
    %37 = arith.addf %35, %36 : vector<8x64xf32>
    %cst_21 = arith.constant dense<0.000000e+00> : vector<64xf32>
    %38 = vector.multi_reduction <add>, %37, %cst_21 [0] : vector<8x64xf32> to vector<64xf32>
    %39 = vector.shape_cast %38 : vector<64xf32> to vector<1x64xf32>
    %cst_22 = arith.constant 8.000000e+00 : f32
    %40 = vector.broadcast %cst_22 : f32 to vector<1x64xf32>
    %41 = arith.divf %39, %40 : vector<1x64xf32>
    %42 = vector.broadcast %41 : vector<1x64xf32> to vector<8x64xf32>
    %43 = arith.subf %37, %42 : vector<8x64xf32>
    %44 = arith.mulf %43, %43 : vector<8x64xf32>
    %cst_23 = arith.constant dense<0.000000e+00> : vector<64xf32>
    %45 = vector.multi_reduction <add>, %44, %cst_23 [0] : vector<8x64xf32> to vector<64xf32>
    %46 = vector.shape_cast %45 : vector<64xf32> to vector<1x64xf32>
    %cst_24 = arith.constant 7.000000e+00 : f32
    %47 = vector.broadcast %cst_24 : f32 to vector<1x64xf32>
    %48 = arith.divf %46, %47 : vector<1x64xf32>
    %49 = math.sqrt %48 : vector<1x64xf32>
    %cst_25 = arith.constant 9.99999997E-7 : f32
    %50 = vector.broadcast %cst_25 : f32 to vector<1x64xf32>
    %51 = arith.addf %49, %50 : vector<1x64xf32>
    %52 = tpu.reciprocal %51 : vector<1x64xf32> -> vector<1x64xf32>
    %53 = vector.broadcast %52 : vector<1x64xf32> to vector<8x64xf32>
    %54 = arith.mulf %43, %53 : vector<8x64xf32>
    %55 = vector.broadcast %2 : vector<8x1xf32> to vector<8x64xf32>
    %56 = arith.mulf %55, %54 : vector<8x64xf32>
    %57 = vector.broadcast %3 : vector<8x1xf32> to vector<8x64xf32>
    %58 = arith.addf %56, %57 : vector<8x64xf32>
    %c1_26 = arith.constant 1 : index
    %c0_27 = arith.constant 0 : index
    %c0_28 = arith.constant 0 : index
    %59 = vector.load %arg7[%c1_26, %c0_27, %c0_28] : memref<2x8x64xf32, #tpu.memory_space<vmem>>, vector<1x8x64xf32>
    %60 = vector.shape_cast %59 : vector<1x8x64xf32> to vector<8x64xf32>
    %61 = vector.shape_cast %58 : vector<8x64xf32> to vector<1x8x64xf32>
    tpu.vector_store %arg7[%c1_26, %c0_27, %c0_28], %61 {strides = array<i32>} : memref<2x8x64xf32, #tpu.memory_space<vmem>>, vector<1x8x64xf32>,
    return
  }
  func.func @transform_0(%arg0: i32, %arg1: i32) -> (i32, i32, i32) {
    %c0_i32 = arith.constant 0 : i32
    %c0_i32_0 = arith.constant 0 : i32
    return %arg0, %c0_i32, %arg1 : i32, i32, i32
  }
  func.func @transform_1(%arg0: i32, %arg1: i32) -> (i32, i32) {
    %c0_i32 = arith.constant 0 : i32
    %c0_i32_0 = arith.constant 0 : i32
    %c0_i32_1 = arith.constant 0 : i32
    return %c0_i32, %c0_i32_0 : i32, i32
  }
  func.func @transform_2(%arg0: i32, %arg1: i32) -> (i32, i32) {
    %c0_i32 = arith.constant 0 : i32
    %c0_i32_0 = arith.constant 0 : i32
    %c0_i32_1 = arith.constant 0 : i32
    return %c0_i32, %c0_i32_0 : i32, i32
  }
  func.func @transform_3(%arg0: i32, %arg1: i32) -> (i32, i32) {
    %c0_i32 = arith.constant 0 : i32
    %c0_i32_0 = arith.constant 0 : i32
    %c0_i32_1 = arith.constant 0 : i32
    return %c0_i32, %c0_i32_0 : i32, i32
  }
  func.func @transform_4(%arg0: i32, %arg1: i32) -> (i32, i32) {
    %c0_i32 = arith.constant 0 : i32
    %c0_i32_0 = arith.constant 0 : i32
    %c0_i32_1 = arith.constant 0 : i32
    return %c0_i32, %c0_i32_0 : i32, i32
  }
  func.func @transform_5(%arg0: i32, %arg1: i32) -> (i32, i32, i32) {
    %c0_i32 = arith.constant 0 : i32
    %c0_i32_0 = arith.constant 0 : i32
    return %arg0, %c0_i32, %arg1 : i32, i32, i32
  }
}

</mosaic_0001>

<bundles_post_ra>
// kernel: tpu_custom_call.1
= control target key start
LH: loop header
LB: loop body
LE: loop exit
PB: predicated region body
PF: predicated region fallthrough
CT: control target
= control target key end

     0   :  { %10 = vsyncpa [#allocation3], 0  ;;  %s1449_s0 = inlined_call_operand.hbm [shape: f32[2,16,64], index: 0, kind: input, shape index: {}]   ;;  %s1450_s1 = inlined_call_operand.vmem [shape: f32[8,16], index: 1, kind: input, shape index: {}]   ;;  %s1451_s2 = inlined_call_operand.vmem [shape: f32[8,1], index: 2, kind: input, shape index: {}]   ;;  %s1452_s3 = inlined_call_operand.vmem [shape: f32[8,1], index: 3, kind: input, shape index: {}]   ;;  %s1453_s4 = inlined_call_operand.vmem [shape: f32[8,1], index: 4, kind: input, shape index: {}]   ;;  %s1454_s5 = inlined_call_operand.hbm [shape: f32[2,8,64], index: 5, kind: output, shape index: {}]  }
   0x1   :  { %11 = vsyncpa [#allocation4], 0  ;;  %s1308_s18 = smov [#allocation2]   ;;  %s1260_s22 = scalar_lea.hbm %s1449_s0, 512 }
   0x2   :  { %s17_s19 = sshll.u32 %s1308_s18, 4  ;;  %p1261_p0 = scmp.ne.s32.totalorder %s1449_s0, %s1260_s22  ;;  %s18_s19 = int_to_ptr.vmem [resolvable:$true] %s17_s19 }
   0x3   :  { %p1264_p1 = scmp.lt.u32.totalorder %s1260_s22, %s1449_s0 }
   0x5   :  { %p1266_p2 = pnand %p1264_p1, %p1261_p0 }
   0x7   :  { %1269 = shalt.err (!%p1266_p2)
}
   0x8   :  { %s1270_s27 = scalar_lea.vmem %s18_s19, 512  ;;  %p1275_p4 = scmp.lt.s32.totalorder %s18_s19, %s18_s19 }
   0x9   :  { %p1271_p3 = scmp.ne.s32.totalorder %s18_s19, %s1270_s27  ;;  %p1276_p5 = scmp.lt.s32.totalorder %s1270_s27, %s1270_s27 }
   0xb   :  { %p1277_p6 = por %p1276_p5, %p1275_p4 }
   0xd   :  { %p1278_p7 = pnand %p1277_p6, %p1271_p3 }
   0xf   :  { %1281 = shalt.err (!%p1278_p7)
}
  0x10   :  { %s1309_s28 = smov 128   ;;  %s1310_s29 = smov 8  }
  0x11   :  { %23 = dma.hbm_to_vmem [thread:$0]  %s1449_s0, 512, %s18_s19, [#allocation3], %s1309_s28, %s1309_s28, %s1310_s29  }
  0x12   :  { %1304 = dma.done.wait [#allocation3], 512  }
  0x13   :  { %1305 = vsyncadd [#allocation3], 4294966784  ;;  %v1311_v0 = vmov 0.0|0.0   ;;  %vm1312_vm0 = vmmov 0   ;;  %v1313_v1 = vmov 0.0   ;;  %v1314_v2 = vmov 0  }
  0x14   :  { %1184 = vmatprep.subr.bf16.mxu0 %v1311_v0  ;;  %1202 = vmatprep.subr.bf16.mxu1 %v1311_v0  ;;  %vm46_vm1 = vcmask 130048   ;;  %v39_v3 = vld [vmem:[#allocation2] sm:$0xff]  ;;  %v40_v4 = vld [vmem:[#allocation2 + $0x8] sm:$0xff]  ;;  %v554_v5 = vld [vmem:[#allocation2 + $0x10] sm:$0xff]  ;;  %vm509_vm2 = vcmask 523264  }
  0x15   :  { %1104 = vmatprep.mubr.msk.f32.mxu0 %vm1312_vm0, %v1313_v1  ;;  %1146 = vmatprep.mubr.msk.f32.mxu1 %vm1312_vm0, %v1313_v1  ;;  %v51_v6 = vand.u32 4294901760, %v39_v3  ;;  %v54_v7 = vand.u32 4294901760, %v40_v4  ;;  %v555_v8 = vld [vmem:[#allocation2 + $0x18] sm:$0xff]  ;;  %v557_v9 = vand.u32 4294901760, %v554_v5  ;;  %v35_v10 = vld [vmem:[%s1450_s1] sm:$0xff] }
  0x16   :  { %1250 = vset.pattern.permute.xlu0 %v1314_v2  ;;  %1251 = vset.pattern.permute.xlu1 %v1314_v2  ;;  %v36_v11 = vld [vmem:[%s1451_s2] sm:$0xff]  ;;  %v560_v12 = vand.u32 4294901760, %v555_v8  ;;  %v48_v13 = vsel %vm46_vm1, %v35_v10, 0 }
  0x17   :  { %43 = vperm.xlu0 %1250, %v36_v11   ;;  %v38_v14 = vld [vmem:[%s1453_s4] sm:$0xff]  ;;  %v1376_v15 = vpack.c.bf16 %v54_v7, %v51_v6  ;;  %v129_v16 = vsub.f32 %v39_v3, %v51_v6  ;;  %v136_v17 = vsub.f32 %v40_v4, %v54_v7  ;;  %v635_v18 = vsub.f32 %v554_v5, %v557_v9 }
  0x18   :  { %548 = vperm.xlu1 %1251, %v38_v14   ;;  %v1378_v19 = vpack.c.bf16 %v560_v12, %v557_v9  ;;  %v642_v20 = vsub.f32 %v555_v8, %v560_v12  ;;  %v1380_v21 = vand.u32 4294901760, %v48_v13  ;;  %v37_v25 = vld [vmem:[%s1452_s3] sm:$0xff]  ;;  %s1315_s3 = smov [#allocation5]  }
  0x19   :  { %1186 = vmatpush3.bf16.msra.mxu0 %v1376_v15  ;;  %v130_v22 = vand.u32 4294901760, %v129_v16  ;;  %v137_v23 = vand.u32 4294901760, %v136_v17  ;;  %v636_v24 = vand.u32 4294901760, %v635_v18  ;;  %v1191_v41 = vpack.c.bf16 %v136_v17, %v129_v16  ;;  %s1052_s4 = sshll.u32 %s1315_s3, 4  ;;  %s1053_s4 = int_to_ptr.vmem [resolvable:$true] %s1052_s4 }
  0x1a   :  { %1204 = vmatpush3.bf16.msra.mxu1 %v1378_v19  ;;  %v118_v26 = vsub.f32 %v48_v13, %v1380_v21  ;;  %1187 = vmatprep.subr.bf16.mxu0 %v1311_v0  ;;  %v643_v27 = vand.u32 4294901760, %v642_v20  ;;  %v1209_v42 = vpack.c.bf16 %v642_v20, %v635_v18  ;;  %s1282_s12 = scalar_lea.vmem %s1053_s4, 256  ;;  %p1287_p9 = scmp.lt.s32.totalorder %s1053_s4, %s1053_s4 }
  0x1b   :  { %1205 = vmatprep.subr.bf16.mxu1 %v1311_v0  ;;  %v131_v28 = vsub.f32 %v129_v16, %v130_v22  ;;  %v138_v29 = vsub.f32 %v136_v17, %v137_v23  ;;  %v637_v30 = vsub.f32 %v635_v18, %v636_v24  ;;  %542 = vperm.xlu0 %1250, %v37_v25   ;;  %p1283_p8 = scmp.ne.s32.totalorder %s1053_s4, %s1282_s12  ;;  %p1288_p10 = scmp.lt.s32.totalorder %s1282_s12, %s1282_s12 }
  0x1c   :  { %v119_v31 = vand.u32 4294901760, %v118_v26  ;;  %v644_v32 = vsub.f32 %v642_v20, %v643_v27  ;;  %v1197_v43 = vpack.c.bf16 %v137_v23, %v130_v22  ;;  %v1215_v44 = vpack.c.bf16 %v643_v27, %v636_v24 }
  0x1d   :  { %v132_v33 = vand.u32 4294901760, %v131_v28  ;;  %v139_v34 = vand.u32 4294901760, %v138_v29  ;;  %v638_v35 = vand.u32 4294901760, %v637_v30  ;;  %p1289_p11 = por %p1288_p10, %p1287_p9 }
  0x1e   :  { %v120_v36 = vsub.f32 %v118_v26, %v119_v31  ;;  %v645_v37 = vand.u32 4294901760, %v644_v32 }
  0x1f   :  { %v1188_v38 = vpack.c.bf16 %v139_v34, %v132_v33  ;;  %p1290_p12 = pnand %p1289_p11, %p1283_p8 }
  0x20   :  { %v121_v39 = vand.u32 4294901760, %v120_v36  ;;  %v1206_v40 = vpack.c.bf16 %v645_v37, %v638_v35 }
  0x22   :  { %1105 = vmatmul.mubr.f32.vlgmr.msra.gmra.mrb[0].mxu0 %v121_v39  ;;  %1147 = vmatmul.mubr.f32.vlgmr.msra.gmra.mrb[0].mxu1 %v121_v39 }
  0x23   :  { %1189 = vmatpush3.bf16.msra.mxu0 %v1188_v38  ;;  %1207 = vmatpush3.bf16.msra.mxu1 %v1206_v40 }
  0x24   :  { %1111 = vmatprep.mubr.msk.f32.mxu0 %vm1312_vm0, %v1313_v1  ;;  %1153 = vmatprep.mubr.msk.f32.mxu1 %vm1312_vm0, %v1313_v1 }
  0x25   :  { %1190 = vmatprep.subr.bf16.mxu0 %v1311_v0  ;;  %1208 = vmatprep.subr.bf16.mxu1 %v1311_v0 }
  0x2a   :  { %1112 = vmatmul.mubr.f32.vlgmr.msra.gmra.mrb[0].mxu0 %v1380_v21  ;;  %1154 = vmatmul.mubr.f32.vlgmr.msra.gmra.mrb[0].mxu1 %v1380_v21 }
  0x2b   :  { %1192 = vmatpush3.bf16.msra.mxu0 %v1191_v41  ;;  %1210 = vmatpush3.bf16.msra.mxu1 %v1209_v42 }
  0x2c   :  { %1118 = vmatprep.mubr.msk.f32.mxu0 %vm1312_vm0, %v1313_v1  ;;  %1160 = vmatprep.mubr.msk.f32.mxu1 %vm1312_vm0, %v1313_v1 }
  0x2d   :  { %1193 = vmatprep.subr.bf16.mxu0 %v1311_v0  ;;  %1211 = vmatprep.subr.bf16.mxu1 %v1311_v0 }
  0x32   :  { %1119 = vmatmul.mubr.f32.vlgmr.msra.gmra.mrb[0].mxu0 %v118_v26  ;;  %1161 = vmatmul.mubr.f32.vlgmr.msra.gmra.mrb[0].mxu1 %v118_v26 }
  0x33   :  { %1195 = vmatpush3.bf16.msra.mxu0 %v1376_v15  ;;  %1213 = vmatpush3.bf16.msra.mxu1 %v1378_v19 }
  0x34   :  { %1125 = vmatprep.mubr.msk.f32.mxu0 %vm1312_vm0, %v1313_v1  ;;  %1167 = vmatprep.mubr.msk.f32.mxu1 %vm1312_vm0, %v1313_v1 }
  0x35   :  { %1196 = vmatprep.subr.bf16.mxu0 %v1311_v0  ;;  %1214 = vmatprep.subr.bf16.mxu1 %v1311_v0 }
  0x3a   :  { %1126 = vmatmul.mubr.f32.vlgmr.msra.gmra.mrb[0].mxu0 %v119_v31  ;;  %1168 = vmatmul.mubr.f32.vlgmr.msra.gmra.mrb[0].mxu1 %v119_v31 }
  0x3b   :  { %1198 = vmatpush3.bf16.msra.mxu0 %v1197_v43  ;;  %1216 = vmatpush3.bf16.msra.mxu1 %v1215_v44 }
  0x3c   :  { %1132 = vmatprep.mubr.msk.f32.mxu0 %vm1312_vm0, %v1313_v1  ;;  %1174 = vmatprep.mubr.msk.f32.mxu1 %vm1312_vm0, %v1313_v1 }
  0x3d   :  { %1199 = vmatprep.subr.bf16.mxu0 %v1311_v0  ;;  %1217 = vmatprep.subr.bf16.mxu1 %v1311_v0 }
  0x42   :  { %1133 = vmatmul.mubr.f32.vlgmr.msra.gmra.mrb[0].mxu0 %v1380_v21  ;;  %1175 = vmatmul.mubr.f32.vlgmr.msra.gmra.mrb[0].mxu1 %v1380_v21 }
  0x43   :  { %1201 = vmatpush3.bf16.msra.mxu0 %v1376_v15  ;;  %1219 = vmatpush3.bf16.msra.mxu1 %v1378_v19 }
  0x44   :  { %1139 = vmatprep.mubr.msk.f32.mxu0 %vm1312_vm0, %v1313_v1  ;;  %1181 = vmatprep.mubr.msk.f32.mxu1 %vm1312_vm0, %v1313_v1 }
  0x4a   :  { %1140 = vmatmul.mubr.f32.vlgmr.msra.gmra.mrb[0].mxu0 %v1380_v21  ;;  %1182 = vmatmul.mubr.f32.vlgmr.msra.gmra.mrb[0].mxu1 %v1380_v21 }
  0x96   :  { %v44_v45 = vpop.permute.xlu0 %43 }
  0x97   :  { %v549_v41 = vpop.permute.xlu1 %548 }
  0x9a   :  { %v543_v39 = vpop.permute.xlu0 %542 }
 0x11d   :  { %v505_v46 = vpop.f32.mrb[0].mxu0  ;;  %v1011_v47 = vpop.f32.mrb[0].mxu1 }
 0x11e   :  { %v1220_v48 = vadd.f32 %v505_v46, %v44_v45  ;;  %v1221_v49 = vadd.f32 %v1011_v47, %v44_v45  ;;  %v1141_v50 = vpop.f32.mrb[1].mxu0  ;;  %v1183_v51 = vpop.f32.mrb[1].mxu1 }
 0x120   :  { %v510_v52 = vsel %vm509_vm2, %v1220_v48, 0.0  ;;  %v1015_v53 = vsel %vm509_vm2, %v1221_v49, 0.0 }
 0x121   :  { %v511_v54 = vrot.slane %v510_v52, 4  ;;  %v1016_v55 = vrot.slane %v1015_v53, 4 }
 0x123   :  { %v512_v56 = vadd.f32 %v511_v54, %v510_v52  ;;  %v1017_v57 = vadd.f32 %v1016_v55, %v1015_v53 }
 0x125   :  { %v513_v58 = vrot.slane %v512_v56, 2  ;;  %v1018_v59 = vrot.slane %v1017_v57, 2 }
 0x127   :  { %v514_v60 = vadd.f32 %v513_v58, %v512_v56  ;;  %v1019_v61 = vadd.f32 %v1018_v59, %v1017_v57 }
 0x129   :  { %v515_v62 = vrot.slane %v514_v60, 1  ;;  %v1020_v63 = vrot.slane %v1019_v61, 1 }
 0x12b   :  { %v516_v0 = vadd.f32 %v515_v62, %v514_v60  ;;  %v1021_v1 = vadd.f32 %v1020_v63, %v1019_v61 }
 0x12d   :  { %v518_v2 = vmul.f32 0.125, %v516_v0  ;;  %v1022_v3 = vmul.f32 0.125, %v1021_v1 }
 0x12f   :  { %v519_v4 = vsub.f32 %v1220_v48, %v518_v2  ;;  %v1023_v5 = vsub.f32 %v1221_v49, %v1022_v3 }
 0x131   :  { %v520_v6 = vmul.f32 %v519_v4, %v519_v4  ;;  %v1024_v7 = vmul.f32 %v1023_v5, %v1023_v5 }
 0x133   :  { %v521_v8 = vsel %vm509_vm2, %v520_v6, 0.0  ;;  %v1025_v9 = vsel %vm509_vm2, %v1024_v7, 0.0 }
 0x134   :  { %v522_v10 = vrot.slane %v521_v8, 4  ;;  %v1026_v11 = vrot.slane %v1025_v9, 4 }
 0x136   :  { %v523_v12 = vadd.f32 %v522_v10, %v521_v8  ;;  %v1027_v13 = vadd.f32 %v1026_v11, %v1025_v9 }
 0x138   :  { %v524_v14 = vrot.slane %v523_v12, 2  ;;  %v1028_v15 = vrot.slane %v1027_v13, 2 }
 0x13a   :  { %v525_v16 = vadd.f32 %v524_v14, %v523_v12  ;;  %v1029_v17 = vadd.f32 %v1028_v15, %v1027_v13 }
 0x13c   :  { %v526_v18 = vrot.slane %v525_v16, 1  ;;  %v1030_v19 = vrot.slane %v1029_v17, 1 }
 0x13e   :  { %v527_v20 = vadd.f32 %v526_v18, %v525_v16  ;;  %v1031_v21 = vadd.f32 %v1030_v19, %v1029_v17 }
 0x140   :  { %v529_v22 = vmul.f32 0.14285715, %v527_v20  ;;  %v1032_v23 = vmul.f32 0.14285715, %v1031_v21 }
 0x142   :  { %1252 = vrsqrt.f32 %v529_v22  ;;  %vm532_vm3 = vcmp.eq.f32.partialorder %v529_v22, inf  ;;  %v535_v27 = vand.u32 2147483648, %v529_v22  ;;  %vm534_vm4 = vcmp.eq.f32.partialorder %v529_v22, 0.0 }
 0x143   :  { %1254 = vrsqrt.f32 %v1032_v23  ;;  %vm1035_vm5 = vcmp.eq.f32.partialorder %v1032_v23, inf  ;;  %v1038_v30 = vand.u32 2147483648, %v1032_v23  ;;  %vm1037_vm6 = vcmp.eq.f32.partialorder %v1032_v23, 0.0 }
 0x14c   :  { %v1253_v24 = vpop.eup %1252 }
 0x14d   :  { %v1255_v25 = vpop.eup %1254  ;;  %v531_v26 = vmul.f32 %v1253_v24, %v529_v22 }
 0x14e   :  { %v1034_v28 = vmul.f32 %v1255_v25, %v1032_v23 }
 0x14f   :  { %v533_v29 = vsel %vm532_vm3, %v529_v22, %v531_v26 }
 0x150   :  { %v536_v31 = vsel %vm534_vm4, %v535_v27, %v533_v29  ;;  %v1036_v32 = vsel %vm1035_vm5, %v1032_v23, %v1034_v28 }
 0x151   :  { %v537_v33 = vadd.f32 1e-06, %v536_v31  ;;  %v1039_v34 = vsel %vm1037_vm6, %v1038_v30, %v1036_v32 }
 0x152   :  { %v1040_v35 = vadd.f32 1e-06, %v1039_v34 }
 0x153   :  { %1256 = vrcp.f32 %v537_v33 }
 0x154   :  { %1258 = vrcp.f32 %v1040_v35 }
 0x15d   :  { %v1257_v36 = vpop.eup %1256 }
 0x15e   :  { %v1259_v37 = vpop.eup %1258  ;;  %v539_v38 = vmul.f32 %v1257_v36, %v519_v4 }
 0x15f   :  { %v1042_v40 = vmul.f32 %v1259_v37, %v1023_v5 }
 0x160   :  { %v545_v42 = vmul.f32 %v543_v39, %v539_v38 }
 0x161   :  { %v1043_v43 = vmul.f32 %v1042_v40, %v543_v39 }
 0x162   :  { %v551_v44 = vadd.f32 %v549_v41, %v545_v42 }
 0x163   :  { %v1044_v45 = vadd.f32 %v1043_v43, %v549_v41 }
 0x164   :  { %552 = vst.msk [vmem:[#allocation5] sm:$0xff] %vm509_vm2, %v551_v44 }
 0x165   :  { %1046 = vst.msk [vmem:[#allocation5 + $0x8] sm:$0xff] %vm509_vm2, %v1044_v45 }
 0x166   :  { %1293 = shalt.err (!%p1290_p12)
}
 0x167   :  { %s1294_s15 = scalar_lea.hbm %s1454_s5, 256 }
 0x168   :  { %p1295_p13 = scmp.ne.s32.totalorder %s1454_s5, %s1294_s15  ;;  %p1298_p0 = scmp.lt.u32.totalorder %s1294_s15, %s1454_s5 }
 0x16a   :  { %p1300_p1 = pnand %p1298_p0, %p1295_p13 }
 0x16c   :  { %1303 = shalt.err (!%p1300_p1)
}
 0x16d   :  { %1058 = dma.vmem_to_hbm [thread:$0]  %s1053_s4, 256, %s1454_s5, [#allocation4], %s1309_s28, %s1309_s28, %s1310_s29  }
 0x16e   :  { %1306 = dma.done.wait [#allocation4], 256  }
 0x16f   :  { %1307 = vsyncadd [#allocation4], 4294967040 }
 0x170   :  { %1062 = vsyncpa [#allocation3], 1 }
 0x171   :  { %1063 = vsyncpa [#allocation4], 1 }

</bundles_post_ra>
